<compile_context>
chip_gen: v7x
topology: tpu7x:2x2x1
jax: 0.10.0
libtpu: 0.0.40
codegen_flags: <defaults>
</compile_context>

<pallas_src>
import functools

import jax
import jax.numpy as jnp
from jax import lax
from jax.experimental import pallas as pl
from jax.experimental.pallas import tpu as pltpu


def _round_up(x, m):
    return (x + m - 1) // m * m


def _pad2(a, rows, cols):
    """Zero-pad a 2-D array up to (rows, cols)."""
    pr = rows - a.shape[0]
    pc = cols - a.shape[1]
    if pr == 0 and pc == 0:
        return a
    return jnp.pad(a, ((0, pr), (0, pc)))


def _linear_small_kernel(x_ref, w_ref, b_ref, o_ref):
    # Single-block path: whole (padded) problem in one grid step.
    # dot_general contracts in_dim of x against in_dim of W (no transpose).
    acc = lax.dot_general(
        x_ref[...], w_ref[...],
        dimension_numbers=(((1,), (1,)), ((), ())),
        preferred_element_type=jnp.float32)          # (M, N)
    o_ref[...] = (acc + b_ref[...]).astype(o_ref.dtype)


def _linear_tiled_kernel(x_ref, w_ref, b_ref, o_ref, acc_ref):
    # Tiled path: accumulate over the K grid axis in a VMEM f32 scratch.
    @pl.when(pl.program_id(2) == 0)
    def _():
        acc_ref[...] = jnp.zeros_like(acc_ref)

    acc_ref[...] += lax.dot_general(
        x_ref[...], w_ref[...],
        dimension_numbers=(((1,), (1,)), ((), ())),
        preferred_element_type=jnp.float32)          # (tm, tn)

    @pl.when(pl.program_id(2) == pl.num_programs(2) - 1)
    def _():
        o_ref[...] = (acc_ref[...] + b_ref[...]).astype(o_ref.dtype)


@functools.partial(jax.jit, static_argnames=("tm", "tn", "tk"))
def multi_classifier_forward(x, weights, bias, *, tm=256, tn=256, tk=512):
    """Pallas implementation of MultiClassifier.forward (a single Linear layer).

    x:       (B, in_dim)       float32
    weights: (out_dim, in_dim) float32
    bias:    (out_dim,)        float32
    returns: (B, out_dim)      float32
    """
    B, in_dim = x.shape
    out_dim = weights.shape[0]

    # Lane-dense / tile-aligned zero padding (zeros leave the math unchanged;
    # the wrapper slices the result back to (B, out_dim)).
    M = _round_up(B, 8)
    K = _round_up(in_dim, 128)
    N = _round_up(out_dim, 128)

    xp = _pad2(x, M, K)
    wp = _pad2(weights, N, K)
    bp = _pad2(bias.reshape(1, out_dim), 1, N)

    # Tiny problems: one grid step, whole (padded) arrays as single blocks.
    # Anything bigger: 3-D tiled grid with an f32 VMEM accumulator.
    operand_bytes = 4 * (M * K + N * K + M * N)
    if operand_bytes <= (4 << 20):
        out_p = pl.pallas_call(
            _linear_small_kernel,
            out_shape=jax.ShapeDtypeStruct((M, N), x.dtype),
            grid_spec=pltpu.PrefetchScalarGridSpec(
                num_scalar_prefetch=0,
                grid=(1,),
                in_specs=[
                    pl.BlockSpec((M, K), lambda i: (0, 0)),
                    pl.BlockSpec((N, K), lambda i: (0, 0)),
                    pl.BlockSpec((1, N), lambda i: (0, 0)),
                ],
                out_specs=pl.BlockSpec((M, N), lambda i: (0, 0)),
            ),
            compiler_params=pltpu.CompilerParams(
                dimension_semantics=("arbitrary",)),
            cost_estimate=pl.CostEstimate(
                flops=2 * M * K * N,
                transcendentals=0,
                bytes_accessed=4 * (M * K + N * K + M * N + N)),
        )(xp, wp, bp)
    else:
        # Clamp tiles to the (padded) problem, then re-pad so tiles divide.
        tm_ = min(tm, M)
        tn_ = min(tn, N)
        tk_ = min(tk, K)
        M2 = _round_up(M, tm_)
        N2 = _round_up(N, tn_)
        K2 = _round_up(K, tk_)
        xp = _pad2(xp, M2, K2)
        wp = _pad2(wp, N2, K2)
        bp = _pad2(bp, 1, N2)

        grid = (M2 // tm_, N2 // tn_, K2 // tk_)
        out_p = pl.pallas_call(
            _linear_tiled_kernel,
            out_shape=jax.ShapeDtypeStruct((M2, N2), x.dtype),
            grid_spec=pltpu.PrefetchScalarGridSpec(
                num_scalar_prefetch=0,
                grid=grid,
                in_specs=[
                    pl.BlockSpec((tm_, tk_), lambda i, j, k: (i, k)),
                    pl.BlockSpec((tn_, tk_), lambda i, j, k: (j, k)),
                    pl.BlockSpec((1, tn_), lambda i, j, k: (0, j)),
                ],
                out_specs=pl.BlockSpec((tm_, tn_), lambda i, j, k: (i, j)),
                scratch_shapes=[pltpu.VMEM((tm_, tn_), jnp.float32)],
            ),
            compiler_params=pltpu.CompilerParams(
                dimension_semantics=("parallel", "parallel", "arbitrary"),
                vmem_limit_bytes=48 * 1024 * 1024),
            cost_estimate=pl.CostEstimate(
                flops=2 * M2 * K2 * N2,
                transcendentals=0,
                bytes_accessed=4 * (M2 * K2 + N2 * K2 + M2 * N2 + N2)),
        )(xp, wp, bp)

    return out_p[:B, :out_dim]


if __name__ == "__main__":
    key = jax.random.PRNGKey(0)
    k_x, k_w, k_b, k_x2, k_w2, k_b2 = jax.random.split(key, 6)

    # --- Small path: shapes matching the module's usage (num_labels = 3) ---
    batch, in_dim, out_dim = 8, 32, 3
    x = jax.random.normal(k_x, (batch, in_dim), dtype=jnp.float32)
    weights = jax.random.normal(k_w, (out_dim, in_dim), dtype=jnp.float32) * 0.1
    bias = jax.random.normal(k_b, (out_dim,), dtype=jnp.float32) * 0.1

    out = multi_classifier_forward(x, weights, bias)
    out = jax.block_until_ready(out)
    ref = x @ weights.T + bias
    assert out.shape == (batch, out_dim)
    assert jnp.allclose(out, ref, atol=1e-5, rtol=1e-5)

    # --- Tiled path: modest scaled shapes to exercise the 3-D grid/accumulator ---
    B2, K2, N2 = 512, 1024, 384
    x2 = jax.random.normal(k_x2, (B2, K2), dtype=jnp.float32)
    w2 = jax.random.normal(k_w2, (N2, K2), dtype=jnp.float32) * 0.05
    b2 = jax.random.normal(k_b2, (N2,), dtype=jnp.float32) * 0.05

    out2 = multi_classifier_forward(x2, w2, b2)
    out2 = jax.block_until_ready(out2)
    ref2 = x2 @ w2.T + b2
    assert out2.shape == (B2, N2)
    assert jnp.allclose(out2, ref2, atol=1e-3, rtol=1e-3)

    print("KERNEL_OK")
</pallas_src>

<mosaic_0001>
module attributes {stable_mosaic.version = 11 : i64} {
  func.func @_linear_small_kernel(%arg0: i32, %arg1: memref<8x128xf32, #tpu.memory_space<vmem>>, %arg2: memref<128x128xf32, #tpu.memory_space<vmem>>, %arg3: memref<1x128xf32, #tpu.memory_space<vmem>>, %arg4: memref<8x128xf32, #tpu.memory_space<vmem>>) attributes {dimension_semantics = [#tpu.dimension_semantics<arbitrary>], iteration_bounds = array<i64: 1>, scalar_prefetch = 0 : i64, scratch_operands = 0 : i64, tpu.core_type = #tpu.core_type<tc>, window_params = [{pipeline_mode = #tpu.pipeline_mode<synchronous>, transform_indices = @transform_0, window_bounds = array<i64: 8, 128>}, {pipeline_mode = #tpu.pipeline_mode<synchronous>, transform_indices = @transform_1, window_bounds = array<i64: 128, 128>}, {pipeline_mode = #tpu.pipeline_mode<synchronous>, transform_indices = @transform_2, window_bounds = array<i64: 1, 128>}, {pipeline_mode = #tpu.pipeline_mode<synchronous>, transform_indices = @transform_3, window_bounds = array<i64: 8, 128>}]} {
    %c0 = arith.constant 0 : index
    %c0_0 = arith.constant 0 : index
    %0 = vector.load %arg1[%c0, %c0_0] : memref<8x128xf32, #tpu.memory_space<vmem>>, vector<8x128xf32>
    %c0_1 = arith.constant 0 : index
    %c0_2 = arith.constant 0 : index
    %1 = vector.load %arg2[%c0_1, %c0_2] : memref<128x128xf32, #tpu.memory_space<vmem>>, vector<128x128xf32>
    %cst = arith.constant dense<0.000000e+00> : vector<8x128xf32>
    %2 = tpu.matmul %0, %1, %cst {dimension_numbers = #tpu.dot_dimension_numbers<[1], [1], [0], [0], [0, 0, 1, 0], [], []>} : vector<8x128xf32>, vector<128x128xf32>, vector<8x128xf32> -> vector<8x128xf32>
    %c0_3 = arith.constant 0 : index
    %c0_4 = arith.constant 0 : index
    %3 = vector.load %arg3[%c0_3, %c0_4] : memref<1x128xf32, #tpu.memory_space<vmem>>, vector<1x128xf32>
    %4 = vector.broadcast %3 : vector<1x128xf32> to vector<8x128xf32>
    %5 = arith.addf %2, %4 : vector<8x128xf32>
    %c0_5 = arith.constant 0 : index
    %c0_6 = arith.constant 0 : index
    %6 = vector.load %arg4[%c0_5, %c0_6] : memref<8x128xf32, #tpu.memory_space<vmem>>, vector<8x128xf32>
    tpu.vector_store %arg4[%c0_5, %c0_6], %5 {strides = array<i32>} : memref<8x128xf32, #tpu.memory_space<vmem>>, vector<8x128xf32>,
    return
  }
  func.func @transform_0(%arg0: i32) -> (i32, i32) {
    %c0_i32 = arith.constant 0 : i32
    %c0_i32_0 = arith.constant 0 : i32
    %c0_i32_1 = arith.constant 0 : i32
    return %c0_i32, %c0_i32_0 : i32, i32
  }
  func.func @transform_1(%arg0: i32) -> (i32, i32) {
    %c0_i32 = arith.constant 0 : i32
    %c0_i32_0 = arith.constant 0 : i32
    %c0_i32_1 = arith.constant 0 : i32
    return %c0_i32, %c0_i32_0 : i32, i32
  }
  func.func @transform_2(%arg0: i32) -> (i32, i32) {
    %c0_i32 = arith.constant 0 : i32
    %c0_i32_0 = arith.constant 0 : i32
    %c0_i32_1 = arith.constant 0 : i32
    return %c0_i32, %c0_i32_0 : i32, i32
  }
  func.func @transform_3(%arg0: i32) -> (i32, i32) {
    %c0_i32 = arith.constant 0 : i32
    %c0_i32_0 = arith.constant 0 : i32
    %c0_i32_1 = arith.constant 0 : i32
    return %c0_i32, %c0_i32_0 : i32, i32
  }
}

</mosaic_0001>

<bundles_post_ra>
// kernel: multi_classifier_forward.1
= control target key start
LH: loop header
LB: loop body
LE: loop exit
PB: predicated region body
PF: predicated region fallthrough
CT: control target
= control target key end

     0   :  { %v193_v0 = vmov 0.0|0.0   ;;  %vm194_vm0 = vmmov 0   ;;  %v195_v3 = vmov 0.0   ;;  %s273_s1 = inlined_call_operand.vmem [shape: f32[128,128], index: 1, kind: input, shape index: {}]   ;;  %s274_s0 = inlined_call_operand.vmem [shape: f32[8,128], index: 0, kind: input, shape index: {}]   ;;  %s275_s2 = inlined_call_operand.vmem [shape: f32[1,128], index: 2, kind: input, shape index: {}]   ;;  %s276_s3 = inlined_call_operand.vmem [shape: f32[8,128], index: 3, kind: output, shape index: {}]  }
   0x1   :  { %166 = vmatprep.subr.bf16.mxu0 %v193_v0  ;;  %v15_v1 = vld [vmem:[%s273_s1] sm:$0xff]  ;;  %v16_v2 = vld [vmem:[%s273_s1 + $0x8] sm:$0xff]  ;;  %163 = vmatprep.mubr.msk.f32.mxu0 %vm194_vm0, %v195_v3  ;;  %v17_v5 = vld [vmem:[%s273_s1 + $0x10] sm:$0xff] }
   0x2   :  { %v167_v4 = vpack.c.bf16 %v16_v2, %v15_v1  ;;  %v18_v6 = vld [vmem:[%s273_s1 + $0x18] sm:$0xff]  ;;  %v19_v8 = vld [vmem:[%s273_s1 + $0x20] sm:$0xff]  ;;  %v20_v9 = vld [vmem:[%s273_s1 + $0x28] sm:$0xff] }
   0x3   :  { %v170_v7 = vpack.c.bf16 %v18_v6, %v17_v5  ;;  %v173_v10 = vpack.c.bf16 %v20_v9, %v19_v8  ;;  %v21_v11 = vld [vmem:[%s273_s1 + $0x30] sm:$0xff]  ;;  %v22_v12 = vld [vmem:[%s273_s1 + $0x38] sm:$0xff]  ;;  %v23_v14 = vld [vmem:[%s273_s1 + $0x40] sm:$0xff] }
   0x4   :  { %168 = vmatpush3.bf16.xpose.msra.mxu0 %v167_v4  ;;  %v176_v13 = vpack.c.bf16 %v22_v12, %v21_v11  ;;  %v24_v15 = vld [vmem:[%s273_s1 + $0x48] sm:$0xff]  ;;  %v25_v17 = vld [vmem:[%s273_s1 + $0x50] sm:$0xff]  ;;  %v26_v18 = vld [vmem:[%s273_s1 + $0x58] sm:$0xff] }
   0x5   :  { %169 = vmatprep.subr.bf16.mxu0 %v193_v0  ;;  %v179_v16 = vpack.c.bf16 %v24_v15, %v23_v14  ;;  %v182_v19 = vpack.c.bf16 %v26_v18, %v25_v17  ;;  %v27_v20 = vld [vmem:[%s273_s1 + $0x60] sm:$0xff]  ;;  %v28_v21 = vld [vmem:[%s273_s1 + $0x68] sm:$0xff]  ;;  %v29_v23 = vld [vmem:[%s273_s1 + $0x70] sm:$0xff] }
   0x6   :  { %v185_v22 = vpack.c.bf16 %v28_v21, %v27_v20  ;;  %v30_v24 = vld [vmem:[%s273_s1 + $0x78] sm:$0xff]  ;;  %v14_v26 = vld [vmem:[%s274_s0] sm:$0xff] }
   0x7   :  { %v188_v25 = vpack.c.bf16 %v30_v24, %v29_v23  ;;  %v113_v27 = vld [vmem:[%s275_s2] ss:$0 sm:$0xff] }
   0xc   :  { %171 = vmatpush3.bf16.xpose.msra.mxu0 %v170_v7 }
   0xd   :  { %172 = vmatprep.subr.bf16.mxu0 %v193_v0 }
  0x14   :  { %174 = vmatpush3.bf16.xpose.msra.mxu0 %v173_v10 }
  0x15   :  { %175 = vmatprep.subr.bf16.mxu0 %v193_v0 }
  0x1c   :  { %177 = vmatpush3.bf16.xpose.msra.mxu0 %v176_v13 }
  0x1d   :  { %178 = vmatprep.subr.bf16.mxu0 %v193_v0 }
  0x24   :  { %180 = vmatpush3.bf16.xpose.msra.mxu0 %v179_v16 }
  0x25   :  { %181 = vmatprep.subr.bf16.mxu0 %v193_v0 }
  0x2c   :  { %183 = vmatpush3.bf16.xpose.msra.mxu0 %v182_v19 }
  0x2d   :  { %184 = vmatprep.subr.bf16.mxu0 %v193_v0 }
  0x34   :  { %186 = vmatpush3.bf16.xpose.msra.mxu0 %v185_v22 }
  0x35   :  { %187 = vmatprep.subr.bf16.mxu0 %v193_v0 }
  0x3c   :  { %189 = vmatpush3.bf16.xpose.msra.mxu0 %v188_v25 }
  0x43   :  { %164 = vmatmul.mubr.f32.vlgmr.msra.gmra.mrb[0].mxu0 %v14_v26 }
 0x116   :  { %v104_v28 = vpop.f32.mrb[0].mxu0 }
 0x117   :  { %v105_v29 = vadd.f32 %v113_v27, %v104_v28  ;;  %v165_v30 = vpop.f32.mrb[1].mxu0 }
 0x119   :  { %108 = vst [vmem:[%s276_s3] sm:$0xff] %v105_v29 }

</bundles_post_ra>
